<compile_context>
chip_gen: v7x
topology: tpu7x:2x2x1
jax: 0.10.0
libtpu: 0.0.40
codegen_flags: <defaults>
</compile_context>

<pallas_src>
import functools

import jax
import jax.numpy as jnp
from jax.experimental import pallas as pl
from jax.experimental.pallas import tpu as pltpu

EPS = 1e-5  # F.layer_norm default


def cross_attention_kernel(x_ref, ctx_ref, gamma_ref, beta_ref,
                           wq_ref, wk_ref, wv_ref, wo_ref, o_ref,
                           *, heads, dim_head, scale):
    f32 = jnp.float32
    bf16 = jnp.bfloat16

    x = x_ref[0].astype(f32)            # (tq, dim)
    ctx = ctx_ref[0].astype(bf16)       # (m, context_dim)  (norm_context=False -> Identity)

    # --- LayerNorm(x): learnable gamma, zero beta buffer (loaded once, broadcast in-vreg) ---
    gamma = gamma_ref[...].astype(f32)  # (1, dim)
    beta = beta_ref[...].astype(f32)    # (1, dim)
    mu = jnp.mean(x, axis=-1, keepdims=True)
    var = jnp.mean(jnp.square(x - mu), axis=-1, keepdims=True)
    xn = (x - mu) * jax.lax.rsqrt(var + EPS) * gamma + beta
    xn_b = xn.astype(bf16)

    # --- Projections (bf16 operands, f32 accumulation on the MXU) ---
    q = jnp.dot(xn_b, wq_ref[...], preferred_element_type=f32) * scale   # (tq, heads*dim_head)
    k = jnp.dot(ctx, wk_ref[...], preferred_element_type=f32)            # (m, dim_head)
    v = jnp.dot(ctx, wv_ref[...], preferred_element_type=f32)            # (m, dim_head)
    k_b = k.astype(bf16)
    v_b = v.astype(bf16)

    tq = x.shape[0]
    dim_out = o_ref.shape[-1]
    acc = jnp.zeros((tq, dim_out), f32)

    # Multi-query attention: k/v are shared across heads. The per-head output
    # projection slab wo[h*dh:(h+1)*dh, :] is folded into the accumulator, which is
    # exactly equivalent to concat-heads followed by `to_out` (no bias).
    for hh in range(heads):
        q_h = q[:, hh * dim_head:(hh + 1) * dim_head].astype(bf16)        # (tq, dh)
        sim = jax.lax.dot_general(q_h, k_b, (((1,), (1,)), ((), ())),
                                  preferred_element_type=f32)             # (tq, m)
        sim = sim - jnp.max(sim, axis=-1, keepdims=True)
        p = jnp.exp(sim)
        attn = p / jnp.sum(p, axis=-1, keepdims=True)
        o_h = jnp.dot(attn.astype(bf16), v_b, preferred_element_type=f32)  # (tq, dh)
        acc = acc + jnp.dot(o_h.astype(bf16),
                            wo_ref[hh * dim_head:(hh + 1) * dim_head, :],
                            preferred_element_type=f32)                    # (tq, dim)

    o_ref[0] = acc.astype(o_ref.dtype)


def cross_attention(x, context, params, *, heads, dim_head, q_block=None):
    """x: (b, n, dim), context: (b, m, context_dim). Returns (b, n, dim)."""
    b, n, dim = x.shape
    _, m, cdim = context.shape
    inner = heads * dim_head
    scale = dim_head ** -0.5

    tq = n if q_block is None else q_block
    assert n % tq == 0 and (tq == n or tq % 8 == 0)

    kernel = functools.partial(cross_attention_kernel,
                               heads=heads, dim_head=dim_head, scale=scale)

    def const(shape):
        # Full-array block with a constant index_map: loaded once, resident across grid.
        return pl.BlockSpec(shape, lambda bi, qi: (0,) * len(shape))

    out = pl.pallas_call(
        kernel,
        out_shape=jax.ShapeDtypeStruct((b, n, dim), x.dtype),
        grid_spec=pltpu.PrefetchScalarGridSpec(
            num_scalar_prefetch=0,
            grid=(b, n // tq),
            in_specs=[
                pl.BlockSpec((1, tq, dim), lambda bi, qi: (bi, qi, 0)),   # x
                pl.BlockSpec((1, m, cdim), lambda bi, qi: (bi, 0, 0)),    # context
                const((1, dim)),            # gamma
                const((1, dim)),            # beta (zeros buffer)
                const((dim, inner)),        # Wq  (in, out), bf16
                const((cdim, dim_head)),    # Wk  (in, out), bf16
                const((cdim, dim_head)),    # Wv  (in, out), bf16
                const((inner, dim)),        # Wo  (in, out), bf16
            ],
            out_specs=pl.BlockSpec((1, tq, dim), lambda bi, qi: (bi, qi, 0)),
        ),
        compiler_params=pltpu.CompilerParams(
            dimension_semantics=("parallel", "parallel"),
            vmem_limit_bytes=48 * 1024 * 1024,
        ),
    )(x, context,
      params["gamma"], params["beta"],
      params["wq"].astype(jnp.bfloat16),
      params["wk"].astype(jnp.bfloat16),
      params["wv"].astype(jnp.bfloat16),
      params["wo"].astype(jnp.bfloat16))
    return out


def init_params(key, dim, context_dim, heads, dim_head):
    ks = jax.random.split(key, 5)
    inner = heads * dim_head
    return {
        # LayerNorm: gamma learnable (randomized so the test is non-trivial), beta = zeros buffer
        "gamma": 1.0 + 0.1 * jax.random.normal(ks[0], (1, dim), jnp.float32),
        "beta": jnp.zeros((1, dim), jnp.float32),
        # Linear weights stored (in, out) so the kernel does x @ W directly (torch W^T)
        "wq": jax.random.normal(ks[1], (dim, inner), jnp.float32) / jnp.sqrt(dim),
        "wk": jax.random.normal(ks[2], (context_dim, dim_head), jnp.float32) / jnp.sqrt(context_dim),
        "wv": jax.random.normal(ks[3], (context_dim, dim_head), jnp.float32) / jnp.sqrt(context_dim),
        "wo": jax.random.normal(ks[4], (inner, dim), jnp.float32) / jnp.sqrt(inner),
    }


def cross_attention_ref(x, context, p, *, heads, dim_head):
    """Pure-JAX (f32) reference mirroring the PyTorch forward."""
    scale = dim_head ** -0.5
    mu = x.mean(-1, keepdims=True)
    var = ((x - mu) ** 2).mean(-1, keepdims=True)
    xn = (x - mu) / jnp.sqrt(var + EPS) * p["gamma"][0] + p["beta"][0]
    q = xn @ p["wq"]
    b, n, _ = q.shape
    q = q.reshape(b, n, heads, dim_head).transpose(0, 2, 1, 3) * scale   # (b,h,n,dh)
    k = context @ p["wk"]                                                # (b,m,dh)
    v = context @ p["wv"]
    sim = jnp.einsum("bhid,bjd->bhij", q, k)
    sim = sim - sim.max(-1, keepdims=True)
    attn = jax.nn.softmax(sim, axis=-1)
    out = jnp.einsum("bhij,bjd->bhid", attn, v)
    out = out.transpose(0, 2, 1, 3).reshape(b, n, heads * dim_head)
    return out @ p["wo"]


if __name__ == "__main__":
    key = jax.random.PRNGKey(0)
    kx, kc, kp = jax.random.split(key, 3)

    # Small but lane-dense shapes (feature dims multiples of 128).
    batch, n, m = 2, 8, 16
    dim, context_dim = 128, 128
    heads, dim_head = 4, 128

    x = jax.random.normal(kx, (batch, n, dim), jnp.float32)
    context = jax.random.normal(kc, (batch, m, context_dim), jnp.float32)
    params = init_params(kp, dim, context_dim, heads, dim_head)

    out = cross_attention(x, context, params, heads=heads, dim_head=dim_head)
    out = jax.block_until_ready(out)

    ref = cross_attention_ref(x, context, params, heads=heads, dim_head=dim_head)
    assert out.shape == (batch, n, dim)
    max_err = jnp.max(jnp.abs(out - ref))
    # bf16 matmuls vs f32 reference -> loosened tolerance (per perf-review guidance)
    assert jnp.allclose(out, ref, atol=5e-2, rtol=5e-2), f"max err {max_err}"

    print("KERNEL_OK")
</pallas_src>

<mosaic_0001>
module attributes {stable_mosaic.version = 11 : i64} {
  func.func @cross_attention_kernel(%arg0: i32, %arg1: i32, %arg2: memref<1x8x128xf32, #tpu.memory_space<vmem>>, %arg3: memref<1x16x128xf32, #tpu.memory_space<vmem>>, %arg4: memref<1x128xf32, #tpu.memory_space<vmem>>, %arg5: memref<1x128xf32, #tpu.memory_space<vmem>>, %arg6: memref<128x512xbf16, #tpu.memory_space<vmem>>, %arg7: memref<128x128xbf16, #tpu.memory_space<vmem>>, %arg8: memref<128x128xbf16, #tpu.memory_space<vmem>>, %arg9: memref<512x128xbf16, #tpu.memory_space<vmem>>, %arg10: memref<1x8x128xf32, #tpu.memory_space<vmem>>) attributes {dimension_semantics = [#tpu.dimension_semantics<parallel>, #tpu.dimension_semantics<parallel>], iteration_bounds = array<i64: 2, 1>, scalar_prefetch = 0 : i64, scratch_operands = 0 : i64, tpu.core_type = #tpu.core_type<tc>, window_params = [{transform_indices = @transform_0, window_bounds = array<i64: 1, 8, 128>}, {transform_indices = @transform_1, window_bounds = array<i64: 1, 16, 128>}, {pipeline_mode = #tpu.pipeline_mode<synchronous>, transform_indices = @transform_2, window_bounds = array<i64: 1, 128>}, {pipeline_mode = #tpu.pipeline_mode<synchronous>, transform_indices = @transform_3, window_bounds = array<i64: 1, 128>}, {pipeline_mode = #tpu.pipeline_mode<synchronous>, transform_indices = @transform_4, window_bounds = array<i64: 128, 512>}, {pipeline_mode = #tpu.pipeline_mode<synchronous>, transform_indices = @transform_5, window_bounds = array<i64: 128, 128>}, {pipeline_mode = #tpu.pipeline_mode<synchronous>, transform_indices = @transform_6, window_bounds = array<i64: 128, 128>}, {pipeline_mode = #tpu.pipeline_mode<synchronous>, transform_indices = @transform_7, window_bounds = array<i64: 512, 128>}, {transform_indices = @transform_8, window_bounds = array<i64: 1, 8, 128>}]} {
    %c0 = arith.constant 0 : index
    %c0_0 = arith.constant 0 : index
    %c0_1 = arith.constant 0 : index
    %0 = vector.load %arg2[%c0, %c0_0, %c0_1] : memref<1x8x128xf32, #tpu.memory_space<vmem>>, vector<1x8x128xf32>
    %1 = vector.shape_cast %0 : vector<1x8x128xf32> to vector<8x128xf32>
    %c0_2 = arith.constant 0 : index
    %c0_3 = arith.constant 0 : index
    %c0_4 = arith.constant 0 : index
    %2 = vector.load %arg3[%c0_2, %c0_3, %c0_4] : memref<1x16x128xf32, #tpu.memory_space<vmem>>, vector<1x16x128xf32>
    %3 = vector.shape_cast %2 : vector<1x16x128xf32> to vector<16x128xf32>
    %4 = arith.truncf %3 : vector<16x128xf32> to vector<16x128xbf16>
    %c0_5 = arith.constant 0 : index
    %c0_6 = arith.constant 0 : index
    %5 = vector.load %arg4[%c0_5, %c0_6] : memref<1x128xf32, #tpu.memory_space<vmem>>, vector<1x128xf32>
    %c0_7 = arith.constant 0 : index
    %c0_8 = arith.constant 0 : index
    %6 = vector.load %arg5[%c0_7, %c0_8] : memref<1x128xf32, #tpu.memory_space<vmem>>, vector<1x128xf32>
    %cst = arith.constant dense<0.000000e+00> : vector<8xf32>
    %7 = vector.multi_reduction <add>, %1, %cst [1] : vector<8x128xf32> to vector<8xf32>
    %8 = vector.shape_cast %7 : vector<8xf32> to vector<8x1xf32>
    %cst_9 = arith.constant 1.280000e+02 : f32
    %9 = vector.broadcast %cst_9 : f32 to vector<8x1xf32>
    %10 = arith.divf %8, %9 : vector<8x1xf32>
    %11 = vector.broadcast %10 : vector<8x1xf32> to vector<8x128xf32>
    %12 = arith.subf %1, %11 : vector<8x128xf32>
    %13 = arith.mulf %12, %12 : vector<8x128xf32>
    %cst_10 = arith.constant dense<0.000000e+00> : vector<8xf32>
    %14 = vector.multi_reduction <add>, %13, %cst_10 [1] : vector<8x128xf32> to vector<8xf32>
    %15 = vector.shape_cast %14 : vector<8xf32> to vector<8x1xf32>
    %cst_11 = arith.constant 1.280000e+02 : f32
    %16 = vector.broadcast %cst_11 : f32 to vector<8x1xf32>
    %17 = arith.divf %15, %16 : vector<8x1xf32>
    %18 = vector.broadcast %10 : vector<8x1xf32> to vector<8x128xf32>
    %19 = arith.subf %1, %18 : vector<8x128xf32>
    %cst_12 = arith.constant 9.99999974E-6 : f32
    %20 = vector.broadcast %cst_12 : f32 to vector<8x1xf32>
    %21 = arith.addf %17, %20 : vector<8x1xf32>
    %22 = math.rsqrt %21 : vector<8x1xf32>
    %23 = vector.broadcast %22 : vector<8x1xf32> to vector<8x128xf32>
    %24 = arith.mulf %19, %23 : vector<8x128xf32>
    %25 = vector.broadcast %5 : vector<1x128xf32> to vector<8x128xf32>
    %26 = arith.mulf %24, %25 : vector<8x128xf32>
    %27 = vector.broadcast %6 : vector<1x128xf32> to vector<8x128xf32>
    %28 = arith.addf %26, %27 : vector<8x128xf32>
    %29 = arith.truncf %28 : vector<8x128xf32> to vector<8x128xbf16>
    %c0_13 = arith.constant 0 : index
    %c0_14 = arith.constant 0 : index
    %30 = vector.load %arg6[%c0_13, %c0_14] : memref<128x512xbf16, #tpu.memory_space<vmem>>, vector<128x512xbf16>
    %cst_15 = arith.constant dense<0.000000e+00> : vector<8x512xf32>
    %31 = tpu.matmul %29, %30, %cst_15 {dimension_numbers = #tpu.dot_dimension_numbers<[1], [0], [0], [1], [0, 0, 1, 1], [], []>} : vector<8x128xbf16>, vector<128x512xbf16>, vector<8x512xf32> -> vector<8x512xf32>
    %cst_16 = arith.constant 0.0883883461 : f32
    %32 = vector.broadcast %cst_16 : f32 to vector<8x512xf32>
    %33 = arith.mulf %31, %32 : vector<8x512xf32>
    %c0_17 = arith.constant 0 : index
    %c0_18 = arith.constant 0 : index
    %34 = vector.load %arg7[%c0_17, %c0_18] : memref<128x128xbf16, #tpu.memory_space<vmem>>, vector<128x128xbf16>
    %cst_19 = arith.constant dense<0.000000e+00> : vector<16x128xf32>
    %35 = tpu.matmul %4, %34, %cst_19 {dimension_numbers = #tpu.dot_dimension_numbers<[1], [0], [0], [1], [0, 0, 1, 1], [], []>} : vector<16x128xbf16>, vector<128x128xbf16>, vector<16x128xf32> -> vector<16x128xf32>
    %c0_20 = arith.constant 0 : index
    %c0_21 = arith.constant 0 : index
    %36 = vector.load %arg8[%c0_20, %c0_21] : memref<128x128xbf16, #tpu.memory_space<vmem>>, vector<128x128xbf16>
    %cst_22 = arith.constant dense<0.000000e+00> : vector<16x128xf32>
    %37 = tpu.matmul %4, %36, %cst_22 {dimension_numbers = #tpu.dot_dimension_numbers<[1], [0], [0], [1], [0, 0, 1, 1], [], []>} : vector<16x128xbf16>, vector<128x128xbf16>, vector<16x128xf32> -> vector<16x128xf32>
    %38 = arith.truncf %35 : vector<16x128xf32> to vector<16x128xbf16>
    %39 = arith.truncf %37 : vector<16x128xf32> to vector<16x128xbf16>
    %cst_23 = arith.constant 0.000000e+00 : f32
    %40 = vector.broadcast %cst_23 : f32 to vector<8x128xf32>
    %41 = vector.extract_strided_slice %33 {offsets = [0, 0], sizes = [8, 128], strides = [1, 1]} : vector<8x512xf32> to vector<8x128xf32>
    %42 = arith.truncf %41 : vector<8x128xf32> to vector<8x128xbf16>
    %cst_24 = arith.constant dense<0.000000e+00> : vector<8x16xf32>
    %43 = tpu.matmul %42, %38, %cst_24 {dimension_numbers = #tpu.dot_dimension_numbers<[1], [1], [0], [0], [0, 0, 1, 0], [], []>} : vector<8x128xbf16>, vector<16x128xbf16>, vector<8x16xf32> -> vector<8x16xf32>
    %cst_25 = arith.constant dense<0xFF800000> : vector<8xf32>
    %44 = vector.multi_reduction <maximumf>, %43, %cst_25 [1] : vector<8x16xf32> to vector<8xf32>
    %45 = vector.shape_cast %44 : vector<8xf32> to vector<8x1xf32>
    %46 = vector.broadcast %45 : vector<8x1xf32> to vector<8x16xf32>
    %47 = arith.subf %43, %46 : vector<8x16xf32>
    %48 = math.exp %47 : vector<8x16xf32>
    %cst_26 = arith.constant dense<0.000000e+00> : vector<8xf32>
    %49 = vector.multi_reduction <add>, %48, %cst_26 [1] : vector<8x16xf32> to vector<8xf32>
    %50 = vector.shape_cast %49 : vector<8xf32> to vector<8x1xf32>
    %51 = vector.broadcast %50 : vector<8x1xf32> to vector<8x16xf32>
    %52 = arith.divf %48, %51 : vector<8x16xf32>
    %53 = arith.truncf %52 : vector<8x16xf32> to vector<8x16xbf16>
    %cst_27 = arith.constant dense<0.000000e+00> : vector<8x128xf32>
    %54 = tpu.matmul %53, %39, %cst_27 {dimension_numbers = #tpu.dot_dimension_numbers<[1], [0], [0], [1], [0, 0, 1, 1], [], []>} : vector<8x16xbf16>, vector<16x128xbf16>, vector<8x128xf32> -> vector<8x128xf32>
    %55 = arith.truncf %54 : vector<8x128xf32> to vector<8x128xbf16>
    %c0_28 = arith.constant 0 : index
    %c0_29 = arith.constant 0 : index
    %56 = vector.load %arg9[%c0_28, %c0_29] : memref<512x128xbf16, #tpu.memory_space<vmem>>, vector<128x128xbf16>
    %cst_30 = arith.constant dense<0.000000e+00> : vector<8x128xf32>
    %57 = tpu.matmul %55, %56, %cst_30 {dimension_numbers = #tpu.dot_dimension_numbers<[1], [0], [0], [1], [0, 0, 1, 1], [], []>} : vector<8x128xbf16>, vector<128x128xbf16>, vector<8x128xf32> -> vector<8x128xf32>
    %58 = arith.addf %40, %57 : vector<8x128xf32>
    %59 = vector.extract_strided_slice %33 {offsets = [0, 128], sizes = [8, 128], strides = [1, 1]} : vector<8x512xf32> to vector<8x128xf32>
    %60 = arith.truncf %59 : vector<8x128xf32> to vector<8x128xbf16>
    %cst_31 = arith.constant dense<0.000000e+00> : vector<8x16xf32>
    %61 = tpu.matmul %60, %38, %cst_31 {dimension_numbers = #tpu.dot_dimension_numbers<[1], [1], [0], [0], [0, 0, 1, 0], [], []>} : vector<8x128xbf16>, vector<16x128xbf16>, vector<8x16xf32> -> vector<8x16xf32>
    %cst_32 = arith.constant dense<0xFF800000> : vector<8xf32>
    %62 = vector.multi_reduction <maximumf>, %61, %cst_32 [1] : vector<8x16xf32> to vector<8xf32>
    %63 = vector.shape_cast %62 : vector<8xf32> to vector<8x1xf32>
    %64 = vector.broadcast %63 : vector<8x1xf32> to vector<8x16xf32>
    %65 = arith.subf %61, %64 : vector<8x16xf32>
    %66 = math.exp %65 : vector<8x16xf32>
    %cst_33 = arith.constant dense<0.000000e+00> : vector<8xf32>
    %67 = vector.multi_reduction <add>, %66, %cst_33 [1] : vector<8x16xf32> to vector<8xf32>
    %68 = vector.shape_cast %67 : vector<8xf32> to vector<8x1xf32>
    %69 = vector.broadcast %68 : vector<8x1xf32> to vector<8x16xf32>
    %70 = arith.divf %66, %69 : vector<8x16xf32>
    %71 = arith.truncf %70 : vector<8x16xf32> to vector<8x16xbf16>
    %cst_34 = arith.constant dense<0.000000e+00> : vector<8x128xf32>
    %72 = tpu.matmul %71, %39, %cst_34 {dimension_numbers = #tpu.dot_dimension_numbers<[1], [0], [0], [1], [0, 0, 1, 1], [], []>} : vector<8x16xbf16>, vector<16x128xbf16>, vector<8x128xf32> -> vector<8x128xf32>
    %73 = arith.truncf %72 : vector<8x128xf32> to vector<8x128xbf16>
    %c128 = arith.constant 128 : index
    %c0_35 = arith.constant 0 : index
    %74 = vector.load %arg9[%c128, %c0_35] : memref<512x128xbf16, #tpu.memory_space<vmem>>, vector<128x128xbf16>
    %cst_36 = arith.constant dense<0.000000e+00> : vector<8x128xf32>
    %75 = tpu.matmul %73, %74, %cst_36 {dimension_numbers = #tpu.dot_dimension_numbers<[1], [0], [0], [1], [0, 0, 1, 1], [], []>} : vector<8x128xbf16>, vector<128x128xbf16>, vector<8x128xf32> -> vector<8x128xf32>
    %76 = arith.addf %58, %75 : vector<8x128xf32>
    %77 = vector.extract_strided_slice %33 {offsets = [0, 256], sizes = [8, 128], strides = [1, 1]} : vector<8x512xf32> to vector<8x128xf32>
    %78 = arith.truncf %77 : vector<8x128xf32> to vector<8x128xbf16>
    %cst_37 = arith.constant dense<0.000000e+00> : vector<8x16xf32>
    %79 = tpu.matmul %78, %38, %cst_37 {dimension_numbers = #tpu.dot_dimension_numbers<[1], [1], [0], [0], [0, 0, 1, 0], [], []>} : vector<8x128xbf16>, vector<16x128xbf16>, vector<8x16xf32> -> vector<8x16xf32>
    %cst_38 = arith.constant dense<0xFF800000> : vector<8xf32>
    %80 = vector.multi_reduction <maximumf>, %79, %cst_38 [1] : vector<8x16xf32> to vector<8xf32>
    %81 = vector.shape_cast %80 : vector<8xf32> to vector<8x1xf32>
    %82 = vector.broadcast %81 : vector<8x1xf32> to vector<8x16xf32>
    %83 = arith.subf %79, %82 : vector<8x16xf32>
    %84 = math.exp %83 : vector<8x16xf32>
    %cst_39 = arith.constant dense<0.000000e+00> : vector<8xf32>
    %85 = vector.multi_reduction <add>, %84, %cst_39 [1] : vector<8x16xf32> to vector<8xf32>
    %86 = vector.shape_cast %85 : vector<8xf32> to vector<8x1xf32>
    %87 = vector.broadcast %86 : vector<8x1xf32> to vector<8x16xf32>
    %88 = arith.divf %84, %87 : vector<8x16xf32>
    %89 = arith.truncf %88 : vector<8x16xf32> to vector<8x16xbf16>
    %cst_40 = arith.constant dense<0.000000e+00> : vector<8x128xf32>
    %90 = tpu.matmul %89, %39, %cst_40 {dimension_numbers = #tpu.dot_dimension_numbers<[1], [0], [0], [1], [0, 0, 1, 1], [], []>} : vector<8x16xbf16>, vector<16x128xbf16>, vector<8x128xf32> -> vector<8x128xf32>
    %91 = arith.truncf %90 : vector<8x128xf32> to vector<8x128xbf16>
    %c256 = arith.constant 256 : index
    %c0_41 = arith.constant 0 : index
    %92 = vector.load %arg9[%c256, %c0_41] : memref<512x128xbf16, #tpu.memory_space<vmem>>, vector<128x128xbf16>
    %cst_42 = arith.constant dense<0.000000e+00> : vector<8x128xf32>
    %93 = tpu.matmul %91, %92, %cst_42 {dimension_numbers = #tpu.dot_dimension_numbers<[1], [0], [0], [1], [0, 0, 1, 1], [], []>} : vector<8x128xbf16>, vector<128x128xbf16>, vector<8x128xf32> -> vector<8x128xf32>
    %94 = arith.addf %76, %93 : vector<8x128xf32>
    %95 = vector.extract_strided_slice %33 {offsets = [0, 384], sizes = [8, 128], strides = [1, 1]} : vector<8x512xf32> to vector<8x128xf32>
    %96 = arith.truncf %95 : vector<8x128xf32> to vector<8x128xbf16>
    %cst_43 = arith.constant dense<0.000000e+00> : vector<8x16xf32>
    %97 = tpu.matmul %96, %38, %cst_43 {dimension_numbers = #tpu.dot_dimension_numbers<[1], [1], [0], [0], [0, 0, 1, 0], [], []>} : vector<8x128xbf16>, vector<16x128xbf16>, vector<8x16xf32> -> vector<8x16xf32>
    %cst_44 = arith.constant dense<0xFF800000> : vector<8xf32>
    %98 = vector.multi_reduction <maximumf>, %97, %cst_44 [1] : vector<8x16xf32> to vector<8xf32>
    %99 = vector.shape_cast %98 : vector<8xf32> to vector<8x1xf32>
    %100 = vector.broadcast %99 : vector<8x1xf32> to vector<8x16xf32>
    %101 = arith.subf %97, %100 : vector<8x16xf32>
    %102 = math.exp %101 : vector<8x16xf32>
    %cst_45 = arith.constant dense<0.000000e+00> : vector<8xf32>
    %103 = vector.multi_reduction <add>, %102, %cst_45 [1] : vector<8x16xf32> to vector<8xf32>
    %104 = vector.shape_cast %103 : vector<8xf32> to vector<8x1xf32>
    %105 = vector.broadcast %104 : vector<8x1xf32> to vector<8x16xf32>
    %106 = arith.divf %102, %105 : vector<8x16xf32>
    %107 = arith.truncf %106 : vector<8x16xf32> to vector<8x16xbf16>
    %cst_46 = arith.constant dense<0.000000e+00> : vector<8x128xf32>
    %108 = tpu.matmul %107, %39, %cst_46 {dimension_numbers = #tpu.dot_dimension_numbers<[1], [0], [0], [1], [0, 0, 1, 1], [], []>} : vector<8x16xbf16>, vector<16x128xbf16>, vector<8x128xf32> -> vector<8x128xf32>
    %109 = arith.truncf %108 : vector<8x128xf32> to vector<8x128xbf16>
    %c384 = arith.constant 384 : index
    %c0_47 = arith.constant 0 : index
    %110 = vector.load %arg9[%c384, %c0_47] : memref<512x128xbf16, #tpu.memory_space<vmem>>, vector<128x128xbf16>
    %cst_48 = arith.constant dense<0.000000e+00> : vector<8x128xf32>
    %111 = tpu.matmul %109, %110, %cst_48 {dimension_numbers = #tpu.dot_dimension_numbers<[1], [0], [0], [1], [0, 0, 1, 1], [], []>} : vector<8x128xbf16>, vector<128x128xbf16>, vector<8x128xf32> -> vector<8x128xf32>
    %112 = arith.addf %94, %111 : vector<8x128xf32>
    %c0_49 = arith.constant 0 : index
    %c0_50 = arith.constant 0 : index
    %c0_51 = arith.constant 0 : index
    %113 = vector.load %arg10[%c0_49, %c0_50, %c0_51] : memref<1x8x128xf32, #tpu.memory_space<vmem>>, vector<1x8x128xf32>
    %114 = vector.shape_cast %113 : vector<1x8x128xf32> to vector<8x128xf32>
    %115 = vector.shape_cast %112 : vector<8x128xf32> to vector<1x8x128xf32>
    tpu.vector_store %arg10[%c0_49, %c0_50, %c0_51], %115 {strides = array<i32>} : memref<1x8x128xf32, #tpu.memory_space<vmem>>, vector<1x8x128xf32>,
    return
  }
  func.func @transform_0(%arg0: i32, %arg1: i32) -> (i32, i32, i32) {
    %c0_i32 = arith.constant 0 : i32
    %c0_i32_0 = arith.constant 0 : i32
    return %arg0, %arg1, %c0_i32 : i32, i32, i32
  }
  func.func @transform_1(%arg0: i32, %arg1: i32) -> (i32, i32, i32) {
    %c0_i32 = arith.constant 0 : i32
    %c0_i32_0 = arith.constant 0 : i32
    %c0_i32_1 = arith.constant 0 : i32
    return %arg0, %c0_i32, %c0_i32_0 : i32, i32, i32
  }
  func.func @transform_2(%arg0: i32, %arg1: i32) -> (i32, i32) {
    %c0_i32 = arith.constant 0 : i32
    %c0_i32_0 = arith.constant 0 : i32
    %c0_i32_1 = arith.constant 0 : i32
    return %c0_i32, %c0_i32_0 : i32, i32
  }
  func.func @transform_3(%arg0: i32, %arg1: i32) -> (i32, i32) {
    %c0_i32 = arith.constant 0 : i32
    %c0_i32_0 = arith.constant 0 : i32
    %c0_i32_1 = arith.constant 0 : i32
    return %c0_i32, %c0_i32_0 : i32, i32
  }
  func.func @transform_4(%arg0: i32, %arg1: i32) -> (i32, i32) {
    %c0_i32 = arith.constant 0 : i32
    %c0_i32_0 = arith.constant 0 : i32
    %c0_i32_1 = arith.constant 0 : i32
    return %c0_i32, %c0_i32_0 : i32, i32
  }
  func.func @transform_5(%arg0: i32, %arg1: i32) -> (i32, i32) {
    %c0_i32 = arith.constant 0 : i32
    %c0_i32_0 = arith.constant 0 : i32
    %c0_i32_1 = arith.constant 0 : i32
    return %c0_i32, %c0_i32_0 : i32, i32
  }
  func.func @transform_6(%arg0: i32, %arg1: i32) -> (i32, i32) {
    %c0_i32 = arith.constant 0 : i32
    %c0_i32_0 = arith.constant 0 : i32
    %c0_i32_1 = arith.constant 0 : i32
    return %c0_i32, %c0_i32_0 : i32, i32
  }
  func.func @transform_7(%arg0: i32, %arg1: i32) -> (i32, i32) {
    %c0_i32 = arith.constant 0 : i32
    %c0_i32_0 = arith.constant 0 : i32
    %c0_i32_1 = arith.constant 0 : i32
    return %c0_i32, %c0_i32_0 : i32, i32
  }
  func.func @transform_8(%arg0: i32, %arg1: i32) -> (i32, i32, i32) {
    %c0_i32 = arith.constant 0 : i32
    %c0_i32_0 = arith.constant 0 : i32
    return %arg0, %arg1, %c0_i32 : i32, i32, i32
  }
}

</mosaic_0001>

<bundles_post_ra>
// kernel: tpu_custom_call.1
= control target key start
LH: loop header
LB: loop body
LE: loop exit
PB: predicated region body
PF: predicated region fallthrough
CT: control target
= control target key end

     0   :  { %s3342_s0 = inlined_call_operand.hbm [shape: f32[2,8,128], index: 0, kind: input, shape index: {}]   ;;  %s3343_s1 = inlined_call_operand.hbm [shape: f32[2,16,128], index: 1, kind: input, shape index: {}]   ;;  %s3344_s2 = inlined_call_operand.vmem [shape: f32[1,128], index: 2, kind: input, shape index: {}]   ;;  %s3345_s3 = inlined_call_operand.vmem [shape: f32[1,128], index: 3, kind: input, shape index: {}]   ;;  %s3346_s4 = inlined_call_operand.hbm [shape: bf16[128,512], index: 4, kind: input, shape index: {}]   ;;  %s3347_s5 = inlined_call_operand.hbm [shape: bf16[128,128], index: 5, kind: input, shape index: {}]   ;;  %s3348_s6 = inlined_call_operand.hbm [shape: bf16[128,128], index: 6, kind: input, shape index: {}]   ;;  %s3349_s7 = inlined_call_operand.hbm [shape: bf16[512,128], index: 7, kind: input, shape index: {}]   ;;  %s3350_s8 = inlined_call_operand.hbm [shape: f32[2,8,128], index: 8, kind: output, shape index: {}]  }
   0x1   :  { %3355 = sst [smem:[#allocation20_spill]] %s3342_s0 }
   0x2   :  { %3356 = sst [smem:[#allocation21_spill]] %s3346_s4 }
   0x3   :  { %3357 = sst [smem:[#allocation22_spill]] %s3347_s5 }
   0x4   :  { %3358 = sst [smem:[#allocation23_spill]] %s3348_s6 }
   0x5   :  { %3359 = sst [smem:[#allocation24_spill]] %s3349_s7 }
   0x6   :  { %3360 = sst [smem:[#allocation25_spill]] %s3350_s8 }
   0x7   :  { %13 = vsyncpa [#allocation3], 0 }
   0x8   :  { %15 = vsyncpa [#allocation3 + $0x1], 0 }
   0x9   :  { %16 = vsyncpa [#allocation6], 0 }
   0xa   :  { %18 = vsyncpa [#allocation6 + $0x1], 0 }
   0xb   :  { %19 = vsyncpa [#allocation9], 0 }
   0xc   :  { %20 = vsyncpa [#allocation12], 0 }
   0xd   :  { %21 = vsyncpa [#allocation4], 0 }
   0xe   :  { %23 = vsyncpa [#allocation4 + $0x1], 0  ;;  %s2850_s27 = smov 0   ;;  %s2852_s28 = smov 0  }
   0xf   :  { %s2854_s29 = smov 0   ;;  %s2856_s30 = smov 0  }
  0x10   :  { %s2858_s9 = smov 0   ;;  %s2860_s10 = smov 0  }
  0x11 LB: > { %s2881_s11 = sadd.s32 4294967295, %s2787_s10   ;;  %p1926_p0 = scmp.ge.s32.totalorder %s2787_s10, 1  ;;  %s2787_s10 = sphi %s2860_s10, %s29_s10   ;;  %s2783_s9 = sphi %s2858_s9, %s3391_s9   ;;  %s2779_s30 = sphi %s2856_s30, %s3390_s30   ;;  %s2775_s29 = sphi %s2854_s29, %s3389_s29   ;;  %s2771_s28 = sphi %s2852_s28, %s3388_s28   ;;  %s2767_s27 = sphi %s2850_s27, %s3387_s27  }
  0x12   : > { %p3352_p1 = scmp.eq.s32.totalorder %s2881_s11, 0  ;;  %p254_p2 = scmp.lt.s32.totalorder %s2787_s10, 3 }
  0x13   : > { %s2789_s13 = smov [#allocation7]   ;;  %s2790_s16 = smov [#allocation8]  }
  0x14   : > { %p2886_p3 = pnand %p1926_p0, %p254_p2  ;;  %s272_s14 = sshll.u32 %s2789_s13, 4  ;;  %s2890_s14 = int_to_ptr.vmem [resolvable:$true] %s272_s14 }
  0x15   : > { %s285_s17 = sshll.u32 %s2790_s16, 4  ;;  %s3363_s4 = sld [smem:[#allocation21_spill]]  ;;  %s2901_s17 = int_to_ptr.vmem [resolvable:$true] %s285_s17 }
  0x16   : > { %s3361_s12 = scalar_select %p2886_p3, 1, 0 }
  0x17   : > { %p2308_p4 = pneg %p2886_p3 }
  0x19   : > { %p2897_p6 = pnand %p2308_p4, %p3352_p1 }
  0x1b   : > { %s2517_s20 = scalar_lea.hbm %s3363_s4, 4096  ;;  %p2911_p8 = pneg %p2897_p6 }
  0x1c   : > { %p2518_p7 = scmp.ne.s32.totalorder %s3363_s4, %s2517_s20  ;;  %p2524_p11 = scmp.lt.u32.totalorder %s2517_s20, %s3363_s4 }
  0x1e   : > { %p2520_p9 = pnand %p2911_p8, %p2518_p7 }
  0x20   : > { %p2521_p10 = pneg %p2520_p9 }
  0x22   : > { %p2526_p12 = pnand %p2524_p11, %p2521_p10 }
  0x24   : > { %2529 = shalt.err (!%p2526_p12)
}
  0x25   : > { %s2530_s26 = scalar_lea.vmem %s2890_s14, 4096  ;;  %p2538_p4 = scmp.lt.s32.totalorder %s2890_s14, %s2890_s14 }
  0x26   : > { %p2531_p13 = scmp.ne.s32.totalorder %s2890_s14, %s2530_s26  ;;  %p2539_p5 = scmp.lt.s32.totalorder %s2530_s26, %s2530_s26 }
  0x28   : > { %p2533_p0 = pnand %p2531_p13, %p2911_p8  ;;  %p2540_p7 = por %p2539_p5, %p2538_p4 }
  0x2a   : > { %p2534_p2 = pneg %p2533_p0 }
  0x2c   : > { %p2541_p9 = pnand %p2540_p7, %p2534_p2 }
  0x2e   : > { %2544 = shalt.err (!%p2541_p9)
}
  0x2f   : > { %s2791_s13 = smov 256   ;;  %s2792_s16 = smov 16  }
  0x30   : > { %2311 = dma.hbm_to_vmem [thread:$0]  (!%p2897_p6), %s3363_s4, 4096, %s2890_s14, [#allocation6], %s2791_s13, %s2791_s13, %s2792_s16  }
  0x31   : > { %s3365_s5 = sld [smem:[#allocation22_spill]] }
  0x37   : > { %s2545_s22 = scalar_lea.hbm %s3365_s5, 1024 }
  0x38   : > { %p2546_p5 = scmp.ne.s32.totalorder %s3365_s5, %s2545_s22  ;;  %p2552_p12 = scmp.lt.u32.totalorder %s2545_s22, %s3365_s5 }
  0x3a   : > { %p2548_p10 = pnand %p2546_p5, %p2911_p8 }
  0x3c   : > { %p2549_p11 = pneg %p2548_p10 }
  0x3e   : > { %p2554_p13 = pnand %p2552_p12, %p2549_p11 }
  0x40   : > { %2557 = shalt.err (!%p2554_p13)
}
  0x41   : > { %s2558_s14 = scalar_lea.vmem %s2901_s17, 1024  ;;  %p2566_p7 = scmp.lt.s32.totalorder %s2901_s17, %s2901_s17 }
  0x42   : > { %p2559_p0 = scmp.ne.s32.totalorder %s2901_s17, %s2558_s14  ;;  %p2567_p9 = scmp.lt.s32.totalorder %s2558_s14, %s2558_s14 }
  0x44   : > { %p2561_p2 = pnand %p2559_p0, %p2911_p8  ;;  %p2568_p5 = por %p2567_p9, %p2566_p7 }
  0x46   : > { %p2562_p4 = pneg %p2561_p2 }
  0x48   : > { %p2569_p10 = pnand %p2568_p5, %p2562_p4 }
  0x4a   : > { %2572 = shalt.err (!%p2569_p10)
}
  0x4b   : > { %s2793_s13 = smov 64   ;;  %s2794_s8 = smov 4  }
  0x4c   : > { %2314 = dma.hbm_to_vmem [thread:$0]  (!%p2897_p6), %s3365_s5, 1024, %s2901_s17, [#allocation9], %s2793_s13, %s2793_s13, %s2794_s8  }
  0x4d   : > { %s2795_s19 = smov [#allocation10]   ;;  %s2796_s21 = smov [#allocation11]  }
  0x4e   : > { %s298_s20 = sshll.u32 %s2795_s19, 4  ;;  %s311_s22 = sshll.u32 %s2796_s21, 4  ;;  %s299_s20 = int_to_ptr.vmem [resolvable:$true] %s298_s20  ;;  %s2958_s22 = int_to_ptr.vmem [resolvable:$true] %s311_s22 }
  0x4f   : > { %s3366_s6 = sld [smem:[#allocation23_spill]] }
  0x55   : > { %s2573_s26 = scalar_lea.hbm %s3366_s6, 1024 }
  0x56   : > { %p2574_p11 = scmp.ne.s32.totalorder %s3366_s6, %s2573_s26  ;;  %p2580_p0 = scmp.lt.u32.totalorder %s2573_s26, %s3366_s6 }
  0x58   : > { %p2576_p12 = pnand %p2574_p11, %p2911_p8 }
  0x5a   : > { %p2577_p13 = pneg %p2576_p12 }
  0x5c   : > { %p2582_p2 = pnand %p2580_p0, %p2577_p13 }
  0x5e   : > { %2585 = shalt.err (!%p2582_p2)
}
  0x5f   : > { %s2586_s18 = scalar_lea.vmem %s299_s20, 1024  ;;  %p2594_p5 = scmp.lt.s32.totalorder %s299_s20, %s299_s20 }
  0x60   : > { %p2587_p4 = scmp.ne.s32.totalorder %s299_s20, %s2586_s18  ;;  %p2595_p10 = scmp.lt.s32.totalorder %s2586_s18, %s2586_s18 }
  0x62   : > { %p2589_p7 = pnand %p2587_p4, %p2911_p8  ;;  %p2596_p1 = por %p2595_p10, %p2594_p5 }
  0x64   : > { %p2590_p9 = pneg %p2589_p7 }
  0x66   : > { %p2597_p3 = pnand %p2596_p1, %p2590_p9 }
  0x68   : > { %2600 = shalt.err (!%p2597_p3)
}
  0x69   : > { %2317 = dma.hbm_to_vmem [thread:$0]  (!%p2897_p6), %s3366_s6, 1024, %s299_s20, [#allocation9], %s2793_s13, %s2793_s13, %s2794_s8  }
  0x6a   : > { %s3367_s7 = sld [smem:[#allocation24_spill]] }
  0x70   : > { %s2601_s25 = scalar_lea.hbm %s3367_s7, 4096 }
  0x71   : > { %p2602_p11 = scmp.ne.s32.totalorder %s3367_s7, %s2601_s25  ;;  %p2608_p12 = scmp.lt.u32.totalorder %s2601_s25, %s3367_s7 }
  0x73   : > { %p2604_p1 = pnand %p2602_p11, %p2911_p8 }
  0x75   : > { %p2605_p3 = pneg %p2604_p1 }
  0x77   : > { %p2610_p13 = pnand %p2608_p12, %p2605_p3 }
  0x79   : > { %2613 = shalt.err (!%p2610_p13)
}
  0x7a   : > { %s2614_s20 = scalar_lea.vmem %s2958_s22, 4096  ;;  %p2622_p7 = scmp.lt.s32.totalorder %s2958_s22, %s2958_s22 }
  0x7b   : > { %p2615_p0 = scmp.ne.s32.totalorder %s2958_s22, %s2614_s20  ;;  %p2623_p9 = scmp.lt.s32.totalorder %s2614_s20, %s2614_s20 }
  0x7d   : > { %p2617_p2 = pnand %p2615_p0, %p2911_p8  ;;  %p2624_p5 = por %p2623_p9, %p2622_p7 }
  0x7f   : > { %p2618_p4 = pneg %p2617_p2 }
  0x81   : > { %p2625_p10 = pnand %p2624_p5, %p2618_p4 }
  0x83   : > { %2628 = shalt.err (!%p2625_p10)
}
  0x84   : > { %2320 = dma.hbm_to_vmem [thread:$0]  (!%p2897_p6), %s3367_s7, 4096, %s2958_s22, [#allocation12], %s2793_s13, %s2793_s13, %s2794_s8  }
  0x85   : > { %s1925_s15 = sadd.s32 4294967294, %s2787_s10   ;;  %s41_s23 = sadd.s32 1, %s2783_s9 }
  0x86   : > { %p43_p8 = scmp.ge.s32.totalorder %s41_s23, 2  ;;  %s50_s19 = sadd.s32 1, %s2775_s29 }
  0x87   : > { %p57_p11 = scmp.ne.s32.totalorder %s2775_s29, %s2771_s28  ;;  %p58_p1 = scmp.eq.s32.totalorder %s2787_s10, 0 }
  0x88   : > { %s3393_s23 = smov (%p43_p8, %s41_s23), 0  ;;  %p63_p12 = scmp.ne.s32.totalorder %s2771_s28, %s2767_s27 }
  0x89   : > { %p3015_p3 = por %p58_p1, %p57_p11  ;;  %s45_s13 = ssub.s32 %s2783_s9, %s3393_s23 }
  0x8a   : > { %p241_p6 = scmp.eq.s32.totalorder %s2881_s11, 1  ;;  %p48_p13 = scmp.eq.s32.totalorder %s45_s13, 0 }
  0x8b   : > { %p3369_p0 = scmp.eq.s32.totalorder %s2881_s11, 0  ;;  %p247_p7 = scmp.eq.s32.totalorder %s1925_s15, 1 }
  0x8c   : > { %p3030_p4 = por %p241_p6, %p57_p11  ;;  %p2336_p5 = scmp.lt.s32.totalorder %s2787_s10, 2 }
  0x8d   : > { %p3026_p2 = por %p3369_p0, %p63_p12  ;;  %p3037_p9 = por %p247_p7, %p63_p12 }
  0x8e   : > { %s3371_s22 = scalar_select %p3030_p4, 1, 0 }
  0x8f   : > { %s3035_s24 = scalar_select %p48_p13, %s2775_s29, %s50_s19  }
  0x90   : > { %s3372_s25 = scalar_select %p3037_p9, 1, 0 }
  0x91   : > { %s3043_s26 = sand.u32 1, %s2775_s29   ;;  %s1933_s14 = sshll.u32 %s2783_s9, 7 }
  0x92   : > { %s1932_s16 = sshll.u32 %s3043_s26, 3  ;;  %s3373_s0 = sld [smem:[#allocation20_spill]] }
  0x93   : > { %s329_s4 = scalar_lea.vmem [#allocation2], %s1932_s16  ;;  %p3054_p10 = pnand %p2336_p5, %p3015_p3 }
  0x94   : > { %s337_s15 = sshll.u32 %s329_s4, 4  ;;  %s326_s5 = scalar_lea.sflag [#allocation3], %s3043_s26  ;;  %s3058_s15 = int_to_ptr.vmem [resolvable:$true] %s337_s15 }
  0x95   : > { %p2631_p11 = pneg %p3054_p10 }
  0x98   : > { %s3050_s18 = scalar_lea.hbm %s3373_s0, %s1933_s14  ;;  %s2634_s16 = scalar_lea.hbm %s3373_s0, 256 }
  0x99   : > { %s2629_s17 = scalar_lea.hbm %s3050_s18, 128  ;;  %p2635_p3 = scmp.lt.u32.totalorder %s3050_s18, %s3373_s0 }
  0x9a   : > { %p2630_p8 = scmp.ne.s32.totalorder %s3050_s18, %s2629_s17  ;;  %p2636_p6 = scmp.lt.u32.totalorder %s2634_s16, %s2629_s17 }
  0x9b   : > { %p2638_p0 = scmp.lt.u32.totalorder %s2629_s17, %s3050_s18 }
  0x9c   : > { %p2632_p1 = pnand %p2631_p11, %p2630_p8  ;;  %p2637_p13 = por %p2636_p6, %p2635_p3 }
  0x9e   : > { %p2633_p12 = pneg %p2632_p1  ;;  %p2639_p7 = por %p2638_p0, %p2637_p13 }
  0xa0   : > { %p2640_p5 = pnand %p2639_p7, %p2633_p12 }
  0xa2   : > { %2643 = shalt.err (!%p2640_p5)
}
  0xa3   : > { %s2644_s13 = scalar_lea.vmem %s3058_s15, 128  ;;  %s2797_s14 = smov [#allocation2]  }
  0xa4   : > { %p2645_p8 = scmp.ne.s32.totalorder %s3058_s15, %s2644_s13  ;;  %s2649_s21 = sshll.u32 %s2797_s14, 4  ;;  %s2650_s21 = int_to_ptr.vmem [resolvable:$false] %s2649_s21 }
  0xa5   : > { %s2651_s20 = scalar_lea.vmem %s2650_s21, 256  ;;  %p2652_p4 = scmp.lt.s32.totalorder %s3058_s15, %s2650_s21 }
  0xa6   : > { %p2647_p1 = pnand %p2645_p8, %p2631_p11  ;;  %p2653_p3 = scmp.lt.s32.totalorder %s2651_s20, %s2644_s13 }
  0xa8   : > { %p2648_p9 = pneg %p2647_p1  ;;  %p2654_p6 = por %p2653_p3, %p2652_p4 }
  0xaa   : > { %p2655_p13 = pnand %p2654_p6, %p2648_p9 }
  0xac   : > { %2658 = shalt.err (!%p2655_p13)
}
  0xad   : > { %2324 = dma.hbm_to_vmem [thread:$0]  (!%p3054_p10), %s3050_s18, 128, %s3058_s15, %s326_s5  }
  0xae   : > { %s2035_s17 = sshll.u32 %s2783_s9, 8  ;;  %s3375_s16 = sshll.u32 %s3043_s26, 4 }
  0xaf   : > { %s348_s4 = scalar_lea.vmem [#allocation5], %s3375_s16  ;;  %s344_s21 = sand.u32 1, %s2787_s10  }
  0xb0   : > { %s355_s14 = sshll.u32 %s348_s4, 4  ;;  %s3096_s0 = scalar_lea.hbm %s3343_s1, %s2035_s17  ;;  %s3090_s14 = int_to_ptr.vmem [resolvable:$true] %s355_s14 }
  0xb1   : > { %s3098_s6 = scalar_lea.sflag [#allocation6], %s344_s21  ;;  %s2659_s7 = scalar_lea.hbm %s3096_s0, 256 }
  0xb2   : > { %p2660_p4 = scmp.ne.s32.totalorder %s3096_s0, %s2659_s7  ;;  %s2664_s18 = scalar_lea.hbm %s3343_s1, 512 }
  0xb3   : > { %p2665_p0 = scmp.lt.u32.totalorder %s3096_s0, %s3343_s1  ;;  %p2666_p7 = scmp.lt.u32.totalorder %s2664_s18, %s2659_s7 }
  0xb4   : > { %p2662_p9 = pnand %p2660_p4, %p2631_p11  ;;  %p2668_p8 = scmp.lt.u32.totalorder %s2659_s7, %s3096_s0 }
  0xb5   : > { %p2667_p5 = por %p2666_p7, %p2665_p0 }
  0xb6   : > { %p2663_p12 = pneg %p2662_p9 }
  0xb7   : > { %p2669_p1 = por %p2668_p8, %p2667_p5 }
  0xb9   : > { %p2670_p3 = pnand %p2669_p1, %p2663_p12 }
  0xbb   : > { %2673 = shalt.err (!%p2670_p3)
}
  0xbc   : > { %s2674_s17 = scalar_lea.vmem %s3090_s14, 256  ;;  %s2798_s4 = smov [#allocation5]  }
  0xbd   : > { %p2675_p6 = scmp.ne.s32.totalorder %s3090_s14, %s2674_s17  ;;  %s2679_s21 = sshll.u32 %s2798_s4, 4  ;;  %s2680_s21 = int_to_ptr.vmem [resolvable:$false] %s2679_s21 }
  0xbe   : > { %s2681_s13 = scalar_lea.vmem %s2680_s21, 512  ;;  %p2682_p9 = scmp.lt.s32.totalorder %s3090_s14, %s2680_s21 }
  0xbf   : > { %p2677_p13 = pnand %p2675_p6, %p2631_p11  ;;  %p2683_p0 = scmp.lt.s32.totalorder %s2681_s13, %s2674_s17 }
  0xc1   : > { %p2678_p4 = pneg %p2677_p13  ;;  %p2684_p7 = por %p2683_p0, %p2682_p9 }
  0xc3   : > { %p2685_p5 = pnand %p2684_p7, %p2678_p4 }
  0xc5   : > { %2688 = shalt.err (!%p2685_p5)
}
  0xc6   : > { %s2799_s7 = smov 128   ;;  %s2800_s20 = smov 8  }
  0xc7   : > { %2327 = dma.hbm_to_vmem [thread:$0]  (!%p3054_p10), %s3096_s0, 256, %s3090_s14, %s3098_s6, %s2799_s7, %s2799_s7, %s2800_s20  }
  0xc8   : > { %p3376_p11 = scmp.ne.s32.totalorder %s3361_s12, 0 }
  0xc9   : > { %s3127_s5 = sand.u32 (!%p3376_p11), 1, %s2771_s28  }
  0xca   : > { %367 = sbr.rel (%p3376_p11) target bundleno = 3330 (0xd02), region = 52  ;;  %s1938_s26 = sshll.u32 (!%p3376_p11), %s3127_s5, 3 }
  0xcb   : > { %s370_s18 = scalar_lea.sflag (!%p3376_p11), [#allocation3], %s3127_s5  ;;  %s373_s15 = scalar_lea.vmem (!%p3376_p11), [#allocation2], %s1938_s26 }
  0xd1   : > { %2742 = dma.done.wait (%p3026_p2), %s370_s18, 128  }
  0xd2   : > { %2744 = vsyncadd (%p3026_p2), %s370_s18, 4294967168  ;;  %s378_s0 = sand.u32 1, %s2881_s11   ;;  %s1939_s6 = sshll.u32 %s3127_s5, 4 }
  0xd3   : > { %s379_s12 = scalar_lea.sflag [#allocation6], %s378_s0  ;;  %s3139_s19 = scalar_lea.vmem [#allocation5], %s1939_s6 }
  0xd4   : > { %2746 = dma.done.wait (%p3026_p2), %s379_s12, 256  }
  0xd5   : > { %2748 = vsyncadd (%p3026_p2), %s379_s12, 4294967040  ;;  %p3377_p10 = scmp.eq.s32.totalorder %s2881_s11, 0 }
  0xd7   : > { %2750 = dma.done.wait (%p3377_p10), [#allocation6], 4096   ;;  %p3378_p12 = pmov %p3377_p10 }
  0xd8   : > { %p3379_p8 = pmov %p3377_p10 }
  0xd9   : > { %2752 = vsyncadd (%p3378_p12), [#allocation6], 4294963200 }
  0xda   : > { %2754 = dma.done.wait (%p3379_p8), [#allocation9], 2048   ;;  %p3380_p1 = pmov %p3379_p8 }
  0xdc   : > { %2756 = vsyncadd (%p3380_p1), [#allocation9], 4294965248  ;;  %p3381_p3 = pmov %p3380_p1 }
  0xdd   : > { %p3382_p6 = pmov %p3380_p1 }
  0xde   : > { %2758 = dma.done.wait (%p3381_p3), [#allocation12], 4096  }
  0xdf   : > { %2760 = vsyncadd (%p3382_p6), [#allocation12], 4294963200  ;;  %v437_v0 = vld [vmem:[%s373_s15] sm:$0xff]  ;;  %v2403_v1 = vld [vmem:[#allocation8] sm:$0xff]   ;;  %v2801_v2 = vmov 0.0   ;;  %vm2802_vm0 = vmmov 0  }
  0xe0   : > { %443 = vadd.xlane.f32.xlu0 %v437_v0  ;;  %2106 = vmatprep.subr.bf16.mxu0 %v2801_v2  ;;  %v2406_v3 = vld [vmem:[#allocation7 + $0x4] ss:$16 sps:$4 sm:$0xff]   ;;  %v2408_v4 = vld [vmem:[#allocation7] ss:$16 sps:$4 sm:$0xff]   ;;  %v2404_v5 = vld [vmem:[#allocation8 + $0x8] sm:$0xff]   ;;  %v2803_v29 = vmov 0  }
  0xe1   : > { %2107 = vmatpush3.bf16.msra.mxu0 %v2403_v1  ;;  %v2410_v6 = vld [vmem:[#allocation7 + $0x24] ss:$16 sps:$4 sm:$0xff]   ;;  %662 = vmatprep.subr.bf16.mxu1 %v2406_v3  ;;  %v2412_v7 = vld [vmem:[#allocation7 + $0x20] ss:$16 sps:$4 sm:$0xff]   ;;  %v2409_v11 = vld [vmem:[#allocation8 + $0x18] sm:$0xff]   ;;  %vm1001_vm1 = vcmask 130048  }
  0xe2   : > { %2108 = vmatprep.subr.bf16.mxu0 %v2801_v2  ;;  %v2414_v8 = vld [vmem:[#allocation7 + $0x44] ss:$16 sps:$4 sm:$0xff]   ;;  %663 = vmatpush1.bf16.msra.mxu1 %v2408_v4  ;;  %v2416_v10 = vld [vmem:[#allocation7 + $0x40] ss:$16 sps:$4 sm:$0xff]   ;;  %v2417_v17 = vld [vmem:[#allocation8 + $0x28] sm:$0xff]   ;;  %s435_s17 = scalar_lea.vmem [#allocation13], %s1938_s26 }
  0xe3   : > { %v2405_v9 = vld [vmem:[#allocation8 + $0x10] sm:$0xff]   ;;  %664 = vmatprep.subr.bf16.mxu1 %v2410_v6  ;;  %v2413_v12 = vld [vmem:[#allocation8 + $0x20] sm:$0xff]   ;;  %2122 = vmatprep.mubr.msk.bf16.mxu0 %vm2802_vm0, %v2801_v2  ;;  %v2425_v24 = vld [vmem:[#allocation8 + $0x38] sm:$0xff]   ;;  %s1783_s4 = sshll.u32 %s435_s17, 4  ;;  %s2032_s21 = sshll.u32 %s2779_s30, 7  ;;  %s3290_s4 = int_to_ptr.vmem [resolvable:$true] %s1783_s4 }
  0xe4   : > { %v2418_v18 = vld [vmem:[#allocation7 + $0x64] ss:$16 sps:$4 sm:$0xff]   ;;  %v2420_v19 = vld [vmem:[#allocation7 + $0x60] ss:$16 sps:$4 sm:$0xff]   ;;  %v439_v26 = vld [vmem:[%s3139_s19 + $0x8] sm:$0xff]  ;;  %694 = vmatprep.mubr.bf16.mxu1 %v2803_v29  ;;  %s3383_s20 = sld [smem:[#allocation25_spill]] }
  0xe5   : > { %2109 = vmatpush3.bf16.msra.mxu0 %v2404_v5  ;;  %v2421_v20 = vld [vmem:[#allocation8 + $0x30] sm:$0xff]   ;;  %v2437_v34 = vld [vmem:[#allocation7 + $0xc] ss:$16 sps:$4 sm:$0xff]   ;;  %v2435_v44 = vld [vmem:[#allocation7 + $0x8] ss:$16 sps:$4 sm:$0xff]   ;;  %s1769_s15 = scalar_lea.sflag [#allocation4], %s3127_s5 }
  0xe6   : > { %2110 = vmatprep.subr.bf16.mxu0 %v2801_v2  ;;  %665 = vmatpush1.bf16.msra.mxu1 %v2412_v7  ;;  %v2422_v21 = vld [vmem:[#allocation7 + $0x84] ss:$16 sps:$4 sm:$0xff]   ;;  %v2424_v22 = vld [vmem:[#allocation7 + $0x80] ss:$16 sps:$4 sm:$0xff]   ;;  %v2440_v46 = vld [vmem:[#allocation7 + $0x2c] ss:$16 sps:$4 sm:$0xff]  }
  0xe7   : > { %666 = vmatprep.subr.bf16.mxu1 %v2414_v8  ;;  %v2426_v23 = vld [vmem:[#allocation7 + $0xa4] ss:$16 sps:$4 sm:$0xff]   ;;  %v2428_v27 = vld [vmem:[#allocation7 + $0xa0] ss:$16 sps:$4 sm:$0xff]   ;;  %v2438_v47 = vld [vmem:[#allocation7 + $0x28] ss:$16 sps:$4 sm:$0xff]  }
  0xe8   : > { %v438_v25 = vld [vmem:[%s3139_s19] sm:$0xff]  ;;  %v2443_v48 = vld [vmem:[#allocation7 + $0x4c] ss:$16 sps:$4 sm:$0xff]   ;;  %v2441_v49 = vld [vmem:[#allocation7 + $0x48] ss:$16 sps:$4 sm:$0xff]   ;;  %s2689_s0 = scalar_lea.vmem %s3290_s4, 128 }
  0xe9   : > { %2111 = vmatpush3.bf16.msra.mxu0 %v2405_v9  ;;  %v2429_v28 = vld [vmem:[#allocation7 + $0xc4] ss:$16 sps:$4 sm:$0xff]   ;;  %v3169_v30 = vpack.c.bf16 %v439_v26, %v438_v25  ;;  %v2431_v31 = vld [vmem:[#allocation7 + $0xc0] ss:$16 sps:$4 sm:$0xff]   ;;  %v2446_v50 = vld [vmem:[#allocation7 + $0x6c] ss:$16 sps:$4 sm:$0xff]   ;;  %p2690_p2 = scmp.ne.s32.totalorder %s3290_s4, %s2689_s0 }
  0xea   : > { %2112 = vmatprep.subr.bf16.mxu0 %v2801_v2  ;;  %667 = vmatpush1.bf16.msra.mxu1 %v2416_v10  ;;  %v2432_v32 = vld [vmem:[#allocation7 + $0xe4] ss:$16 sps:$4 sm:$0xff]   ;;  %v2434_v33 = vld [vmem:[#allocation7 + $0xe0] ss:$16 sps:$4 sm:$0xff]   ;;  %v2444_v51 = vld [vmem:[#allocation7 + $0x68] ss:$16 sps:$4 sm:$0xff]   ;;  %s3295_s18 = scalar_lea.hbm %s3383_s20, %s2032_s21 }
  0xeb   : > { %668 = vmatprep.subr.bf16.mxu1 %v2418_v18  ;;  %v1945_v39 = vld [vmem:[%s3344_s2] ss:$0 sm:$0xff]  ;;  %v2449_v52 = vld [vmem:[#allocation7 + $0x8c] ss:$16 sps:$4 sm:$0xff]   ;;  %v2447_v53 = vld [vmem:[#allocation7 + $0x88] ss:$16 sps:$4 sm:$0xff]  }
  0xec   : > { %v1946_v41 = vld [vmem:[%s3345_s3] ss:$0 sm:$0xff]  ;;  %v2452_v54 = vld [vmem:[#allocation7 + $0xac] ss:$16 sps:$4 sm:$0xff]   ;;  %v2450_v55 = vld [vmem:[#allocation7 + $0xa8] ss:$16 sps:$4 sm:$0xff]  }
  0xed   : > { %2113 = vmatpush3.bf16.msra.mxu0 %v2409_v11  ;;  %v2455_v56 = vld [vmem:[#allocation7 + $0xcc] ss:$16 sps:$4 sm:$0xff]   ;;  %v2453_v57 = vld [vmem:[#allocation7 + $0xc8] ss:$16 sps:$4 sm:$0xff]   ;;  %v2459_v60 = vld [vmem:[#allocation10] sm:$0xff]   ;;  %p3384_p13 = scmp.ne.s32.totalorder %s3371_s22, 0 }
  0xee   : > { %2114 = vmatprep.subr.bf16.mxu0 %v2801_v2  ;;  %669 = vmatpush1.bf16.msra.mxu1 %v2420_v19  ;;  %v2458_v58 = vld [vmem:[#allocation7 + $0xec] ss:$16 sps:$4 sm:$0xff]   ;;  %v2456_v59 = vld [vmem:[#allocation7 + $0xe8] ss:$16 sps:$4 sm:$0xff]   ;;  %v2461_v62 = vld [vmem:[#allocation10 + $0x10] sm:$0xff]   ;;  %s2804_s30 = smov [#allocation13]  }
  0xef   : > { %670 = vmatprep.subr.bf16.mxu1 %v2422_v21  ;;  %v2460_v61 = vld [vmem:[#allocation10 + $0x8] sm:$0xff]   ;;  %v2462_v63 = vld [vmem:[#allocation10 + $0x18] sm:$0xff]   ;;  %v2465_v3 = vld [vmem:[#allocation10 + $0x30] sm:$0xff]   ;;  %p2691_p4 = pnand %p2690_p2, %p3384_p13  ;;  %s2693_s26 = sshll.u32 %s2804_s30, 4  ;;  %s2694_s26 = int_to_ptr.vmem [resolvable:$false] %s2693_s26 }
  0xf0   : > { %v2464_v1 = vld [vmem:[#allocation10 + $0x28] sm:$0xff]   ;;  %v2466_v4 = vld [vmem:[#allocation10 + $0x38] sm:$0xff]   ;;  %s2695_s6 = scalar_lea.vmem %s2694_s26, 256  ;;  %p2696_p0 = scmp.lt.s32.totalorder %s3290_s4, %s2694_s26 }
  0xf1   : > { %2115 = vmatpush3.bf16.msra.mxu0 %v2413_v12  ;;  %p2692_p9 = pneg %p2691_p4  ;;  %p2697_p7 = scmp.lt.s32.totalorder %s2695_s6, %s2689_s0 }
  0xf2   : > { %2116 = vmatprep.subr.bf16.mxu0 %v2801_v2  ;;  %671 = vmatpush1.bf16.msra.mxu1 %v2424_v22 }
  0xf3   : > { %672 = vmatprep.subr.bf16.mxu1 %v2426_v23  ;;  %p2698_p5 = por %p2697_p7, %p2696_p0 }
  0xf5   : > { %2117 = vmatpush3.bf16.msra.mxu0 %v2417_v17  ;;  %p2699_p11 = pnand %p2698_p5, %p2692_p9 }
  0xf6   : > { %2118 = vmatprep.subr.bf16.mxu0 %v2801_v2  ;;  %673 = vmatpush1.bf16.msra.mxu1 %v2428_v27 }
  0xf7   : > { %674 = vmatprep.subr.bf16.mxu1 %v2429_v28 }
  0xf9   : > { %2119 = vmatpush3.bf16.msra.mxu0 %v2421_v20 }
  0xfa   : > { %2120 = vmatprep.subr.bf16.mxu0 %v2801_v2  ;;  %675 = vmatpush1.bf16.msra.mxu1 %v2431_v31 }
  0xfb   : > { %676 = vmatprep.subr.bf16.mxu1 %v2432_v32 }
  0xfd   : > { %2121 = vmatpush3.bf16.msra.mxu0 %v2425_v24 }
  0xfe   : > { %2170 = vmatprep.subr.bf16.mxu0 %v2801_v2  ;;  %677 = vmatpush1.bf16.msra.mxu1 %v2434_v33 }
  0xff   : > { %703 = vmatprep.subr.bf16.mxu1 %v2437_v34 }
 0x100   : > { %2123 = vmatmul.mubr.bf16.vlgmr.msra.gmra.mrb[0].mxu0 %v3169_v30 }
 0x101   : > { %2186 = vmatprep.mubr.msk.bf16.mxu0 %vm2802_vm0, %v2801_v2 }
 0x16d   : > { %v444_v13 = vpop.xlane.xlu0 %443 }
 0x16e   : > { %v446_v14 = vmul.f32 0.0078125, %v444_v13 }
 0x170   : > { %v447_v15 = vsub.f32 %v437_v0, %v446_v14  ;;  %v2463_v0 = vld [vmem:[#allocation10 + $0x20] sm:$0xff]  }
 0x172   : > { %v448_v16 = vmul.f32 %v447_v15, %v447_v15 }
 0x174   : > { %449 = vadd.xlane.f32.xlu0 %v448_v16 }
 0x1d3   : > { %v846_v5 = vpop.f32.mrb[0].mxu0 }
 0x1d4   : > { %v2124_v6 = vpop.f32.mrb[1].mxu0 }
 0x1d5   : > { %v849_v7 = vpop.f32.mrb[2].mxu0 }
 0x1d6   : > { %v3195_v8 = vpack.c.bf16 %v849_v7, %v846_v5  ;;  %v2125_v9 = vpop.f32.mrb[3].mxu0  ;;  %v2475_v7 = vld [vmem:[#allocation11] sm:$0xff]  }
 0x201   : > { %v450_v35 = vpop.xlane.xlu0 %449 }
 0x202   : > { %v451_v36 = vmul.f32 0.0078125, %v450_v35 }
 0x204   : > { %v452_v37 = vadd.f32 1e-05, %v451_v36 }
 0x206   : > { %2499 = vrsqrt.f32 %v452_v37 }
 0x210   : > { %v2500_v38 = vpop.eup %2499 }
 0x211   : > { %v454_v40 = vmul.f32 %v2500_v38, %v447_v15 }
 0x213   : > { %v461_v42 = vmul.f32 %v1945_v39, %v454_v40 }
 0x215   : > { %v468_v43 = vadd.f32 %v1946_v41, %v461_v42 }
 0x217   : > { %v469_v45 = vpack.c.bf16 %v468_v43, %v468_v43 }
 0x219   : > { %695 = vmatmul.mubr.bf16.vlgmr.msra.gmra.mrb[0].mxu1 %v469_v45 }
 0x21a   : > { %704 = vmatpush1.bf16.msra.mxu1 %v2435_v44  ;;  %735 = vmatprep.mubr.bf16.mxu1 %v2803_v29 }
 0x21b   : > { %705 = vmatprep.subr.bf16.mxu1 %v2440_v46 }
 0x21e   : > { %706 = vmatpush1.bf16.msra.mxu1 %v2438_v47 }
 0x21f   : > { %707 = vmatprep.subr.bf16.mxu1 %v2443_v48 }
 0x222   : > { %708 = vmatpush1.bf16.msra.mxu1 %v2441_v49 }
 0x223   : > { %709 = vmatprep.subr.bf16.mxu1 %v2446_v50 }
 0x226   : > { %710 = vmatpush1.bf16.msra.mxu1 %v2444_v51 }
 0x227   : > { %711 = vmatprep.subr.bf16.mxu1 %v2449_v52 }
 0x22a   : > { %712 = vmatpush1.bf16.msra.mxu1 %v2447_v53 }
 0x22b   : > { %713 = vmatprep.subr.bf16.mxu1 %v2452_v54 }
 0x22e   : > { %714 = vmatpush1.bf16.msra.mxu1 %v2450_v55  ;;  %v2467_v55 = vld [vmem:[#allocation11 + $0x40] sm:$0xff]  }
 0x22f   : > { %715 = vmatprep.subr.bf16.mxu1 %v2455_v56  ;;  %2171 = vmatpush3.bf16.msra.mxu0 %v2467_v55  ;;  %v2468_v56 = vld [vmem:[#allocation11 + $0x48] sm:$0xff]  }
 0x230   : > { %2172 = vmatprep.subr.bf16.mxu0 %v2801_v2 }
 0x232   : > { %716 = vmatpush1.bf16.msra.mxu1 %v2453_v57  ;;  %v2469_v57 = vld [vmem:[#allocation11 + $0x50] sm:$0xff]  }
 0x233   : > { %717 = vmatprep.subr.bf16.mxu1 %v2458_v58  ;;  %2173 = vmatpush3.bf16.msra.mxu0 %v2468_v56  ;;  %v2470_v58 = vld [vmem:[#allocation11 + $0x58] sm:$0xff]  }
 0x234   : > { %2174 = vmatprep.subr.bf16.mxu0 %v2801_v2 }
 0x236   : > { %718 = vmatpush1.bf16.msra.mxu1 %v2456_v59  ;;  %v2471_v59 = vld [vmem:[#allocation11 + $0x60] sm:$0xff]  }
 0x237   : > { %2126 = vmatprep.subr.bf16.mxu1 %v2801_v2  ;;  %2175 = vmatpush3.bf16.msra.mxu0 %v2469_v57 }
 0x238   : > { %2176 = vmatprep.subr.bf16.mxu0 %v2801_v2 }
 0x239   : > { %736 = vmatmul.mubr.bf16.vlgmr.msra.gmra.mrb[4].mxu1 %v469_v45 }
 0x23a   : > { %2127 = vmatpush3.bf16.msra.mxu1 %v2459_v60  ;;  %2142 = vmatprep.mubr.msk.bf16.mxu1 %vm2802_vm0, %v2801_v2  ;;  %v2472_v60 = vld [vmem:[#allocation11 + $0x68] sm:$0xff]  }
 0x23b   : > { %2128 = vmatprep.subr.bf16.mxu1 %v2801_v2  ;;  %2177 = vmatpush3.bf16.msra.mxu0 %v2470_v58 }
 0x23c   : > { %2178 = vmatprep.subr.bf16.mxu0 %v2801_v2 }
 0x23e   : > { %2129 = vmatpush3.bf16.msra.mxu1 %v2460_v61  ;;  %v2473_v61 = vld [vmem:[#allocation11 + $0x70] sm:$0xff]  }
 0x23f   : > { %2130 = vmatprep.subr.bf16.mxu1 %v2801_v2  ;;  %2179 = vmatpush3.bf16.msra.mxu0 %v2471_v59  ;;  %v2491_v59 = vld [vmem:[#allocation11 + $0xc0] sm:$0xff]  }
 0x240   : > { %2180 = vmatprep.subr.bf16.mxu0 %v2801_v2 }
 0x242   : > { %2131 = vmatpush3.bf16.msra.mxu1 %v2461_v62  ;;  %v2474_v62 = vld [vmem:[#allocation11 + $0x78] sm:$0xff]  }
 0x243   : > { %2132 = vmatprep.subr.bf16.mxu1 %v2801_v2  ;;  %2181 = vmatpush3.bf16.msra.mxu0 %v2472_v60  ;;  %v2492_v60 = vld [vmem:[#allocation11 + $0xc8] sm:$0xff]  }
 0x244   : > { %2182 = vmatprep.subr.bf16.mxu0 %v2801_v2 }
 0x246   : > { %2133 = vmatpush3.bf16.msra.mxu1 %v2462_v63 }
 0x247   : > { %2134 = vmatprep.subr.bf16.mxu1 %v2801_v2  ;;  %2183 = vmatpush3.bf16.msra.mxu0 %v2473_v61  ;;  %v2493_v61 = vld [vmem:[#allocation11 + $0xd0] sm:$0xff]  }
 0x248   : > { %2184 = vmatprep.subr.bf16.mxu0 %v2801_v2 }
 0x24a   : > { %2135 = vmatpush3.bf16.msra.mxu1 %v2463_v0 }
 0x24b   : > { %2136 = vmatprep.subr.bf16.mxu1 %v2801_v2  ;;  %2185 = vmatpush3.bf16.msra.mxu0 %v2474_v62  ;;  %v2494_v62 = vld [vmem:[#allocation11 + $0xd8] sm:$0xff]  }
 0x24c   : > { %2190 = vmatprep.subr.bf16.mxu0 %v2801_v2 }
 0x24e   : > { %2137 = vmatpush3.bf16.msra.mxu1 %v2464_v1 }
 0x24f   : > { %2138 = vmatprep.subr.bf16.mxu1 %v2801_v2 }
 0x252   : > { %2139 = vmatpush3.bf16.msra.mxu1 %v2465_v3 }
 0x253   : > { %2140 = vmatprep.subr.bf16.mxu1 %v2801_v2 }
 0x256   : > { %2141 = vmatpush3.bf16.msra.mxu1 %v2466_v4 }
 0x257   : > { %2146 = vmatprep.subr.bf16.mxu1 %v2801_v2 }
 0x259   : > { %2143 = vmatmul.mubr.bf16.vlgmr.msra.gmra.mrb[8].mxu1 %v3169_v30 }
 0x25a   : > { %2148 = vmatprep.mubr.msk.bf16.mxu1 %vm2802_vm0, %v2801_v2 }
 0x25f   : > { %2147 = vmatpush3.bf16.xpose.msra.mxu1 %v3195_v8 }
 0x260   : > { %2152 = vmatprep.subr.bf16.mxu1 %v2801_v2 }
 0x2ec   : > { %v696_v10 = vpop.f32.mrb[0].mxu1 }
 0x2ed   : > { %v744_v11 = vmul.f32 0.088388346, %v696_v10  ;;  %v698_v12 = vpop.f32.mrb[1].mxu1 }
 0x2ee   : > { %v700_v13 = vpop.f32.mrb[2].mxu1  ;;  %v745_v39 = vmul.f32 0.088388346, %v698_v12 }
 0x2ef   : > { %v960_v14 = vpack.c.bf16 %v744_v11, %v744_v11  ;;  %v701_v15 = vpop.f32.mrb[3].mxu1  ;;  %v2476_v13 = vld [vmem:[#allocation11 + $0x8] sm:$0xff]  }
 0x2f0   : > { %v1074_v40 = vpack.c.bf16 %v745_v39, %v745_v39  ;;  %v2477_v15 = vld [vmem:[#allocation11 + $0x10] sm:$0xff]  }
 0x2f1   : > { %2149 = vmatmul.mubr.bf16.vlgmr.msra.gmra.mrb[12].mxu1 %v960_v14  ;;  %v2489_v39 = vld [vmem:[#allocation11 + $0xb0] sm:$0xff]  }
 0x2f2   : > { %2154 = vmatprep.mubr.msk.bf16.mxu1 %vm2802_vm0, %v2801_v2 }
 0x30c   : > { %v3201_v16 = vpop.f32.mrb[4].mxu1 }
 0x30d   : > { %v3203_v17 = vpop.f32.mrb[5].mxu1  ;;  %v746_v4 = vmul.f32 0.088388346, %v3201_v16 }
 0x30e   : > { %v741_v18 = vpop.f32.mrb[6].mxu1 }
 0x30f   : > { %v742_v19 = vpop.f32.mrb[7].mxu1  ;;  %v1363_v5 = vpack.c.bf16 %v746_v4, %v746_v4 }
 0x32c   : > { %v951_v20 = vpop.f32.mrb[8].mxu1 }
 0x32d   : > { %v2144_v21 = vpop.f32.mrb[9].mxu1 }
 0x32e   : > { %v954_v22 = vpop.f32.mrb[10].mxu1  ;;  %v2478_v21 = vld [vmem:[#allocation11 + $0x18] sm:$0xff]  }
 0x32f   : > { %v3205_v23 = vpack.c.bf16 %v954_v22, %v951_v20  ;;  %v2145_v24 = vpop.f32.mrb[11].mxu1  ;;  %v2479_v22 = vld [vmem:[#allocation11 + $0x20] sm:$0xff]  }
 0x330   : > { %v2480_v24 = vld [vmem:[#allocation11 + $0x28] sm:$0xff]  }
 0x331   : > { %2153 = vmatpush3.bf16.msra.mxu1 %v3205_v23 }
 0x332   : > { %2158 = vmatprep.subr.bf16.mxu1 %v2801_v2 }
 0x3c4   : > { %v995_v25 = vpop.f32.mrb[12].mxu1 }
 0x3c5   : > { %v2150_v26 = vpop.f32.mrb[13].mxu1  ;;  %v1002_v27 = vsel %vm1001_vm1, %v995_v25, -inf }
 0x3c6   : > { %1003 = vmax.xlane.f32.xlu1 %v1002_v27  ;;  %v998_v28 = vpop.f32.mrb[14].mxu1  ;;  %v2482_v26 = vld [vmem:[#allocation11 + $0x38] sm:$0xff]  }
 0x3c7   : > { %v2151_v29 = vpop.f32.mrb[15].mxu1 }
 0x453   : > { %v1004_v30 = vpop.xlane.xlu1 %1003 }
 0x454   : > { %v1005_v31 = vsub.f32 %v995_v25, %v1004_v30  ;;  %v2481_v25 = vld [vmem:[#allocation11 + $0x30] sm:$0xff]  }
 0x456   : > { %v1006_v32 = vmul.f32 1.442695, %v1005_v31 }
 0x458   : > { %2501 = vpow2.f32 %v1006_v32 }
 0x462   : > { %v2502_v33 = vpop.eup %2501 }
 0x463   : > { %v1008_v34 = vsel %vm1001_vm1, %v2502_v33, 0.0 }
 0x464   : > { %1009 = vadd.xlane.f32.xlu1 %v1008_v34  ;;  %v2484_v34 = vld [vmem:[#allocation11 + $0x88] sm:$0xff]  }
 0x4f1   : > { %v1010_v35 = vpop.xlane.xlu1 %1009 }
 0x4f2   : > { %2503 = vrcp.f32 %v1010_v35  ;;  %v2485_v35 = vld [vmem:[#allocation11 + $0x90] sm:$0xff]  }
 0x4fc   : > { %v2504_v36 = vpop.eup %2503 }
 0x4fd   : > { %v1012_v37 = vmul.f32 %v2504_v36, %v2502_v33  ;;  %v2483_v33 = vld [vmem:[#allocation11 + $0x80] sm:$0xff]   ;;  %v2486_v36 = vld [vmem:[#allocation11 + $0x98] sm:$0xff]  }
 0x4ff   : > { %v1013_v38 = vpack.c.bf16 %v1012_v37, %v1012_v37  ;;  %v2487_v37 = vld [vmem:[#allocation11 + $0xa0] sm:$0xff]  }
 0x501   : > { %2155 = vmatmul.mubr.msk.bf16.vlgmr.msra.gmra.mrb[16].mxu1 %vm1001_vm1, %v1013_v38  ;;  %v2488_v38 = vld [vmem:[#allocation11 + $0xa8] sm:$0xff]  }
 0x502   : > { %2159 = vmatpush3.bf16.xpose.msra.mxu1 %v3195_v8  ;;  %2160 = vmatprep.mubr.msk.bf16.mxu1 %vm2802_vm0, %v2801_v2 }
 0x503   : > { %2164 = vmatprep.subr.bf16.mxu1 %v2801_v2 }
 0x509   : > { %2161 = vmatmul.mubr.bf16.vlgmr.msra.gmra.mrb[20].mxu1 %v1074_v40 }
 0x50a   : > { %2165 = vmatpush3.bf16.msra.mxu1 %v3205_v23  ;;  %2166 = vmatprep.mubr.msk.bf16.mxu1 %vm2802_vm0, %v2801_v2 }
 0x50b   : > { %2210 = vmatprep.subr.bf16.mxu1 %v2801_v2 }
 0x5d4   : > { %v3220_v41 = vpop.f32.mrb[16].mxu1 }
 0x5d5   : > { %v2156_v42 = vpop.f32.mrb[17].mxu1  ;;  %v1057_v27 = vpack.c.bf16 %v3220_v41, %v3220_v41 }
 0x5d6   : > { %v1054_v43 = vpop.f32.mrb[18].mxu1 }
 0x5d7   : > { %v2157_v44 = vpop.f32.mrb[19].mxu1 }
 0x5d8   : > { %v747_v44 = vmul.f32 0.088388346, %v3203_v17 }
 0x5dc   : > { %v1109_v45 = vpop.f32.mrb[20].mxu1 }
 0x5dd   : > { %v2162_v46 = vpop.f32.mrb[21].mxu1  ;;  %v1115_v47 = vsel %vm1001_vm1, %v1109_v45, -inf }
 0x5de   : > { %1116 = vmax.xlane.f32.xlu0 %v1115_v47  ;;  %v1112_v48 = vpop.f32.mrb[22].mxu1  ;;  %v2490_v46 = vld [vmem:[#allocation11 + $0xb8] sm:$0xff]  }
 0x5df   : > { %v2163_v49 = vpop.f32.mrb[23].mxu1 }
 0x66b   : > { %v1117_v50 = vpop.xlane.xlu0 %1116 }
 0x66c   : > { %v1118_v51 = vsub.f32 %v1109_v45, %v1117_v50  ;;  %v1565_v45 = vpack.c.bf16 %v747_v44, %v747_v44 }
 0x66e   : > { %v1119_v52 = vmul.f32 1.442695, %v1118_v51 }
 0x670   : > { %2505 = vpow2.f32 %v1119_v52 }
 0x67a   : > { %v2506_v53 = vpop.eup %2505 }
 0x67b   : > { %v1121_v54 = vsel %vm1001_vm1, %v2506_v53, 0.0 }
 0x67c   : > { %1122 = vadd.xlane.f32.xlu1 %v1121_v54 }
 0x709   : > { %v1123_v63 = vpop.xlane.xlu1 %1122 }
 0x70a   : > { %2507 = vrcp.f32 %v1123_v63  ;;  %v2495_v63 = vld [vmem:[#allocation11 + $0xe0] sm:$0xff]  }
 0x714   : > { %v2508_v0 = vpop.eup %2507 }
 0x715   : > { %v1125_v1 = vmul.f32 %v2508_v0, %v2506_v53  ;;  %v2496_v0 = vld [vmem:[#allocation11 + $0xe8] sm:$0xff]  }
 0x717   : > { %v1126_v3 = vpack.c.bf16 %v1125_v1, %v1125_v1  ;;  %v2497_v1 = vld [vmem:[#allocation11 + $0xf0] sm:$0xff]  }
 0x719   : > { %2167 = vmatmul.mubr.msk.bf16.vlgmr.msra.gmra.mrb[24].mxu1 %vm1001_vm1, %v1126_v3 }
 0x71a   : > { %2211 = vmatpush3.bf16.xpose.msra.mxu1 %v3195_v8  ;;  %2212 = vmatprep.mubr.msk.bf16.mxu1 %vm2802_vm0, %v2801_v2 }
 0x71b   : > { %2216 = vmatprep.subr.bf16.mxu1 %v2801_v2 }
 0x721   : > { %2213 = vmatmul.mubr.bf16.vlgmr.msra.gmra.mrb[28].mxu1 %v1363_v5 }
 0x722   : > { %2217 = vmatpush3.bf16.msra.mxu1 %v3205_v23  ;;  %2218 = vmatprep.mubr.msk.bf16.mxu1 %vm2802_vm0, %v2801_v2 }
 0x723   : > { %2242 = vmatprep.subr.bf16.mxu1 %v2801_v2 }
 0x7ec   : > { %v1164_v6 = vpop.f32.mrb[24].mxu1 }
 0x7ed   : > { %v1170_v9 = vpack.c.bf16 %v1164_v6, %v1164_v6  ;;  %v2168_v10 = vpop.f32.mrb[25].mxu1 }
 0x7ee   : > { %v1167_v11 = vpop.f32.mrb[26].mxu1 }
 0x7ef   : > { %v2169_v12 = vpop.f32.mrb[27].mxu1  ;;  %2187 = vmatmul.mubr.bf16.vlgmr.msra.gmra.mrb[4].mxu0 %v1170_v9 }
 0x7f0   : > { %2191 = vmatpush3.bf16.msra.mxu0 %v2475_v7  ;;  %2206 = vmatprep.mubr.msk.bf16.mxu0 %vm2802_vm0, %v2801_v2  ;;  %v2498_v7 = vld [vmem:[#allocation11 + $0xf8] sm:$0xff]  }
 0x7f1   : > { %2192 = vmatprep.subr.bf16.mxu0 %v2801_v2 }
 0x7f4   : > { %2193 = vmatpush3.bf16.msra.mxu0 %v2476_v13  ;;  %v1398_v14 = vpop.f32.mrb[28].mxu1 }
 0x7f5   : > { %v2214_v16 = vpop.f32.mrb[29].mxu1  ;;  %2194 = vmatprep.subr.bf16.mxu0 %v2801_v2  ;;  %v1404_v18 = vsel %vm1001_vm1, %v1398_v14, -inf }
 0x7f6   : > { %1405 = vmax.xlane.f32.xlu0 %v1404_v18  ;;  %v1401_v19 = vpop.f32.mrb[30].mxu1 }
 0x7f7   : > { %v2215_v20 = vpop.f32.mrb[31].mxu1 }
 0x7f8   : > { %2195 = vmatpush3.bf16.msra.mxu0 %v2477_v15 }
 0x7f9   : > { %2196 = vmatprep.subr.bf16.mxu0 %v2801_v2 }
 0x7fc   : > { %2197 = vmatpush3.bf16.msra.mxu0 %v2478_v21 }
 0x7fd   : > { %2198 = vmatprep.subr.bf16.mxu0 %v2801_v2 }
 0x800   : > { %2199 = vmatpush3.bf16.msra.mxu0 %v2479_v22 }
 0x801   : > { %2200 = vmatprep.subr.bf16.mxu0 %v2801_v2 }
 0x804   : > { %2201 = vmatpush3.bf16.msra.mxu0 %v2480_v24 }
 0x805   : > { %2202 = vmatprep.subr.bf16.mxu0 %v2801_v2 }
 0x808   : > { %2203 = vmatpush3.bf16.msra.mxu0 %v2481_v25 }
 0x809   : > { %2204 = vmatprep.subr.bf16.mxu0 %v2801_v2 }
 0x80c   : > { %2205 = vmatpush3.bf16.msra.mxu0 %v2482_v26 }
 0x80d   : > { %2222 = vmatprep.subr.bf16.mxu0 %v2801_v2 }
 0x80f   : > { %2207 = vmatmul.mubr.bf16.vlgmr.msra.gmra.mrb[4].mxu0 %v1057_v27 }
 0x810   : > { %2238 = vmatprep.mubr.msk.bf16.mxu0 %vm2802_vm0, %v2801_v2  ;;  %2223 = vmatpush3.bf16.msra.mxu0 %v2483_v33 }
 0x811   : > { %2224 = vmatprep.subr.bf16.mxu0 %v2801_v2 }
 0x814   : > { %2225 = vmatpush3.bf16.msra.mxu0 %v2484_v34 }
 0x815   : > { %2226 = vmatprep.subr.bf16.mxu0 %v2801_v2 }
 0x818   : > { %2227 = vmatpush3.bf16.msra.mxu0 %v2485_v35 }
 0x819   : > { %2228 = vmatprep.subr.bf16.mxu0 %v2801_v2 }
 0x81c   : > { %2229 = vmatpush3.bf16.msra.mxu0 %v2486_v36 }
 0x81d   : > { %2230 = vmatprep.subr.bf16.mxu0 %v2801_v2 }
 0x820   : > { %2231 = vmatpush3.bf16.msra.mxu0 %v2487_v37 }
 0x821   : > { %2232 = vmatprep.subr.bf16.mxu0 %v2801_v2 }
 0x824   : > { %2233 = vmatpush3.bf16.msra.mxu0 %v2488_v38 }
 0x825   : > { %2234 = vmatprep.subr.bf16.mxu0 %v2801_v2 }
 0x828   : > { %2235 = vmatpush3.bf16.msra.mxu0 %v2489_v39 }
 0x829   : > { %2236 = vmatprep.subr.bf16.mxu0 %v2801_v2 }
 0x82c   : > { %2237 = vmatpush3.bf16.msra.mxu0 %v2490_v46 }
 0x82d   : > { %2254 = vmatprep.subr.bf16.mxu0 %v2801_v2 }
 0x883   : > { %v1406_v28 = vpop.xlane.xlu0 %1405 }
 0x884   : > { %v1407_v29 = vsub.f32 %v1398_v14, %v1406_v28 }
 0x886   : > { %v1408_v30 = vmul.f32 1.442695, %v1407_v29 }
 0x888   : > { %2509 = vpow2.f32 %v1408_v30 }
 0x892   : > { %v2510_v31 = vpop.eup %2509 }
 0x893   : > { %v1410_v32 = vsel %vm1001_vm1, %v2510_v31, 0.0 }
 0x894   : > { %1411 = vadd.xlane.f32.xlu1 %v1410_v32 }
 0x921   : > { %v1412_v40 = vpop.xlane.xlu1 %1411 }
 0x922   : > { %2511 = vrcp.f32 %v1412_v40 }
 0x92c   : > { %v2512_v41 = vpop.eup %2511 }
 0x92d   : > { %v1414_v42 = vmul.f32 %v2512_v41, %v2510_v31 }
 0x92f   : > { %v1415_v43 = vpack.c.bf16 %v1414_v42, %v1414_v42 }
 0x931   : > { %2219 = vmatmul.mubr.msk.bf16.vlgmr.msra.gmra.mrb[32].mxu1 %vm1001_vm1, %v1415_v43 }
 0x932   : > { %2243 = vmatpush3.bf16.xpose.msra.mxu1 %v3195_v8  ;;  %2244 = vmatprep.mubr.msk.bf16.mxu1 %vm2802_vm0, %v2801_v2 }
 0x933   : > { %2248 = vmatprep.subr.bf16.mxu1 %v2801_v2 }
 0x939   : > { %2245 = vmatmul.mubr.bf16.vlgmr.msra.gmra.mrb[36].mxu1 %v1565_v45 }
 0x93a   : > { %2249 = vmatpush3.bf16.msra.mxu1 %v3205_v23  ;;  %2250 = vmatprep.mubr.msk.bf16.mxu1 %vm2802_vm0, %v2801_v2 }
 0xa04   : > { %v1453_v47 = vpop.f32.mrb[32].mxu1 }
 0xa05   : > { %v1459_v8 = vpack.c.bf16 %v1453_v47, %v1453_v47  ;;  %v2220_v48 = vpop.f32.mrb[33].mxu1 }
 0xa06   : > { %v1456_v49 = vpop.f32.mrb[34].mxu1 }
 0xa07   : > { %v2221_v50 = vpop.f32.mrb[35].mxu1  ;;  %2239 = vmatmul.mubr.bf16.vlgmr.msra.gmra.mrb[4].mxu0 %v1459_v8 }
 0xa08   : > { %2270 = vmatprep.mubr.msk.bf16.mxu0 %vm2802_vm0, %v2801_v2  ;;  %2255 = vmatpush3.bf16.msra.mxu0 %v2491_v59 }
 0xa09   : > { %2256 = vmatprep.subr.bf16.mxu0 %v2801_v2 }
 0xa0c   : > { %v1600_v17 = vpop.f32.mrb[36].mxu1  ;;  %2257 = vmatpush3.bf16.msra.mxu0 %v2492_v60 }
 0xa0d   : > { %v2246_v51 = vpop.f32.mrb[37].mxu1  ;;  %v1606_v23 = vsel %vm1001_vm1, %v1600_v17, -inf  ;;  %2258 = vmatprep.subr.bf16.mxu0 %v2801_v2 }
 0xa0e   : > { %1607 = vmax.xlane.f32.xlu0 %v1606_v23  ;;  %v1603_v52 = vpop.f32.mrb[38].mxu1 }
 0xa0f   : > { %v2247_v53 = vpop.f32.mrb[39].mxu1 }
 0xa10   : > { %2259 = vmatpush3.bf16.msra.mxu0 %v2493_v61 }
 0xa11   : > { %2260 = vmatprep.subr.bf16.mxu0 %v2801_v2 }
 0xa14   : > { %2261 = vmatpush3.bf16.msra.mxu0 %v2494_v62 }
 0xa15   : > { %2262 = vmatprep.subr.bf16.mxu0 %v2801_v2 }
 0xa18   : > { %2263 = vmatpush3.bf16.msra.mxu0 %v2495_v63 }
 0xa19   : > { %2264 = vmatprep.subr.bf16.mxu0 %v2801_v2 }
 0xa1c   : > { %2265 = vmatpush3.bf16.msra.mxu0 %v2496_v0 }
 0xa1d   : > { %2266 = vmatprep.subr.bf16.mxu0 %v2801_v2 }
 0xa20   : > { %2267 = vmatpush3.bf16.msra.mxu0 %v2497_v1 }
 0xa21   : > { %2268 = vmatprep.subr.bf16.mxu0 %v2801_v2 }
 0xa24   : > { %2269 = vmatpush3.bf16.msra.mxu0 %v2498_v7 }
 0xa9b   : > { %v1608_v54 = vpop.xlane.xlu0 %1607 }
 0xa9c   : > { %v1609_v55 = vsub.f32 %v1600_v17, %v1608_v54 }
 0xa9e   : > { %v1610_v56 = vmul.f32 1.442695, %v1609_v55 }
 0xaa0   : > { %2513 = vpow2.f32 %v1610_v56 }
 0xaaa   : > { %v2514_v57 = vpop.eup %2513 }
 0xaab   : > { %v1612_v58 = vsel %vm1001_vm1, %v2514_v57, 0.0 }
 0xaac   : > { %1613 = vadd.xlane.f32.xlu1 %v1612_v58 }
 0xb39   : > { %v1614_v3 = vpop.xlane.xlu1 %1613 }
 0xb3a   : > { %2515 = vrcp.f32 %v1614_v3 }
 0xb44   : > { %v2516_v4 = vpop.eup %2515 }
 0xb45   : > { %v1616_v5 = vmul.f32 %v2516_v4, %v2514_v57 }
 0xb47   : > { %v1617_v6 = vpack.c.bf16 %v1616_v5, %v1616_v5 }
 0xb49   : > { %2251 = vmatmul.mubr.msk.bf16.vlgmr.msra.gmra.mrb[40].mxu1 %vm1001_vm1, %v1617_v6 }
 0xc1c   : > { %v1655_v9 = vpop.f32.mrb[40].mxu1 }
 0xc1d   : > { %v1661_v10 = vpack.c.bf16 %v1655_v9, %v1655_v9  ;;  %v2252_v11 = vpop.f32.mrb[41].mxu1 }
 0xc1e   : > { %v1658_v12 = vpop.f32.mrb[42].mxu1 }
 0xc1f   : > { %v2253_v13 = vpop.f32.mrb[43].mxu1  ;;  %2271 = vmatmul.mubr.bf16.vlgmr.msra.gmra.mrb[4].mxu0 %v1661_v10 }
 0xcf2   : > { %v1760_v2 = vpop.f32.mrb[4].mxu0 }
 0xcf3   : > { %1767 = vst [vmem:[%s435_s17] sm:$0xff] %v1760_v2  ;;  %v2272_v14 = vpop.f32.mrb[5].mxu0 }
 0xcf4   : > { %v1763_v15 = vpop.f32.mrb[6].mxu0 }
 0xcf5   : > { %2702 = shalt.err (!%p2699_p11)
}
 0xcf6   : > { %s2703_s5 = scalar_lea.hbm %s3295_s18, 128  ;;  %s2707_s11 = scalar_lea.hbm %s3383_s20, 256 }
 0xcf7   : > { %p2704_p10 = scmp.ne.s32.totalorder %s3295_s18, %s2703_s5  ;;  %p2708_p1 = scmp.lt.u32.totalorder %s3295_s18, %s3383_s20 }
 0xcf8   : > { %p2709_p3 = scmp.lt.u32.totalorder %s2707_s11, %s2703_s5  ;;  %p2711_p2 = scmp.lt.u32.totalorder %s2703_s5, %s3295_s18 }
 0xcf9   : > { %p2705_p12 = pnand %p2704_p10, %p3384_p13 }
 0xcfa   : > { %p2710_p6 = por %p2709_p3, %p2708_p1 }
 0xcfb   : > { %p2706_p8 = pneg %p2705_p12 }
 0xcfc   : > { %p2712_p4 = por %p2711_p2, %p2710_p6 }
 0xcfe   : > { %p2713_p9 = pnand %p2712_p4, %p2706_p8 }
 0xd00   : > { %2716 = shalt.err (!%p2713_p9)
}
 0xd01   : > { %2306 = dma.vmem_to_hbm [thread:$0]  (%p3384_p13), %s3290_s4, 128, %s3295_s18, %s1769_s15   ;;  %v2273_v16 = vpop.f32.mrb[7].mxu0 }
 0xd02 PF: > { %s1795_s16 = sand.u32 1, %s2767_s27   ;;  %p3385_p0 = scmp.ne.s32.totalorder %s3372_s25, 0 }
 0xd03   : > { %p3386_p7 = scmp.ge.s32.totalorder %s2787_s10, 2  ;;  %s1796_s17 = scalar_lea.sflag [#allocation4], %s1795_s16 }
 0xd05   : > { %p2329_p5 = pnand %p3386_p7, %p3385_p0 }
 0xd07   : > { %2762 = dma.done.wait (!%p2329_p5), %s1796_s17, 128  }
 0xd08   : > { %2764 = vsyncadd (!%p2329_p5), %s1796_s17, 4294967168  ;;  %s29_s10 = sadd.s32 1, %s2787_s10   ;;  %s3387_s27 = smov %s2771_s28 }
 0xd09   : > { %p26_p11 = scmp.ge.s32.totalorder %s29_s10, 4   ;;  %s3388_s28 = smov %s2775_s29 }
 0xd0a   : > { %s3389_s29 = smov %s3035_s24  ;;  %s3390_s30 = smov %s2783_s9 }
 0xd0b   : > { %s3391_s9 = smov %s3393_s23  ;;  %28 = sbr.rel (!%p26_p11) target bundleno = 17 (0x11), region = 126 }
 0xd12   :  { %1801 = vsyncpa [#allocation3], 1 }
 0xd13   :  { %1803 = vsyncpa [#allocation3 + $0x1], 1 }
 0xd14   :  { %1804 = vsyncpa [#allocation6], 1 }
 0xd15   :  { %1806 = vsyncpa [#allocation6 + $0x1], 1 }
 0xd16   :  { %1807 = vsyncpa [#allocation9], 1 }
 0xd17   :  { %1808 = vsyncpa [#allocation12], 1 }
 0xd18   :  { %1809 = vsyncpa [#allocation4], 1 }
 0xd19   :  { %1811 = vsyncpa [#allocation4 + $0x1], 1 }

</bundles_post_ra>
